<compile_context>
chip_gen: v6e
topology: v6e:2x2x1
jax: 0.10.0
libtpu: 0.0.40
codegen_flags: <defaults>
</compile_context>

<pallas_src>
import math
from typing import NamedTuple

import jax
import jax.numpy as jnp
from jax.experimental import pallas as pl
from jax.experimental.pallas import tpu as pltpu


def _round_up(a: int, b: int) -> int:
    return (a + b - 1) // b * b


def _cdiv(a: int, b: int) -> int:
    return -(-a // b)


def _vmem_capacity_bytes() -> int:
    try:
        return int(pltpu.get_tpu_info().vmem_capacity_bytes)
    except Exception:
        return 64 * 1024 * 1024  # conservative (v7x per-core VMEM)


def _default_vmem_budget() -> int:
    return int(0.85 * _vmem_capacity_bytes())


class FFNParams(NamedTuple):
    w13: jax.Array   # (dim, 2*hp)  tile-interleaved [w1^T tile_k | w3^T tile_k]
    w2t: jax.Array   # (hp, dim)    w2^T, hidden rows zero-padded
    dim: int
    hidden: int
    hp: int          # padded hidden (multiple of ht)
    ht: int          # hidden tile (multiple of 128)
    n_ht: int        # number of hidden tiles


def prepare_ffn_weights(w1: jax.Array, w2: jax.Array, w3: jax.Array, *,
                        vmem_budget: int | None = None,
                        hidden_tile: int | None = None) -> FFNParams:
    """One-time weight prep.  PyTorch nn.Linear layouts:
         w1, w3: (hidden, dim)      w2: (dim, hidden)
    Hoist this out of the per-call path (parameter setup time)."""
    hidden, dim = w1.shape
    assert w3.shape == (hidden, dim), w3.shape
    assert w2.shape == (dim, hidden), w2.shape

    wsize = jnp.dtype(w1.dtype).itemsize
    if vmem_budget is None:
        vmem_budget = _default_vmem_budget()
    weight_budget = vmem_budget // 2           # leave room for activations/acc

    hp128 = _round_up(hidden, 128)
    resident_bytes = 3 * dim * hp128 * wsize   # single-buffered w13 + w2t

    if hidden_tile is not None:
        ht = _round_up(int(hidden_tile), 128)
    elif resident_bytes <= weight_budget:
        ht = hp128                             # fully resident, one hidden tile
    else:
        # Streamed weight tiles, double-buffered: 2 * 3*dim*ht*wsize <= budget.
        ht_max = weight_budget // (6 * dim * wsize)
        ht_max = max(128, min((ht_max // 128) * 128, 2048, hp128))
        # Pick the candidate (multiple of 128) minimizing padded hidden.
        best = None
        cand = 128
        while cand <= ht_max:
            key = (_round_up(hidden, cand), -cand)
            if best is None or key < best[0]:
                best = (key, cand)
            cand += 128
        ht = best[1]

    hp = _round_up(hidden, ht)
    n_ht = hp // ht
    pad_h = hp - hidden

    w1t = jnp.pad(w1.T, ((0, 0), (0, pad_h)))   # (dim, hp)
    w3t = jnp.pad(w3.T, ((0, 0), (0, pad_h)))   # (dim, hp)
    w2t = jnp.pad(w2.T, ((0, pad_h), (0, 0)))   # (hp, dim)

    # Tile-interleave: columns [k*2ht : (k+1)*2ht] = [w1^T tile k | w3^T tile k].
    w13 = jnp.concatenate(
        [w1t.reshape(dim, n_ht, ht), w3t.reshape(dim, n_ht, ht)], axis=2
    ).reshape(dim, 2 * hp)

    return FFNParams(w13=w13, w2t=w2t, dim=dim, hidden=hidden, hp=hp, ht=ht, n_ht=n_ht)


def _swiglu_ffn_kernel(x_ref, w13_ref, w2_ref, o_ref, acc_ref):
    """x: (tile, dim); w13: (dim, 2*ht); w2: (ht, dim); acc: (tile, dim) f32."""
    k = pl.program_id(1)

    @pl.when(k == 0)
    def _init():
        acc_ref[...] = jnp.zeros_like(acc_ref)

    ht = w2_ref.shape[0]
    x = x_ref[...]
    # Fused gate+up projection: one MXU push, N = 2*ht (lane-aligned slices).
    h13 = jnp.dot(x, w13_ref[...], preferred_element_type=jnp.float32)
    h1 = h13[:, :ht]
    h3 = h13[:, ht:]
    h = (h1 * jax.nn.sigmoid(h1)) * h3          # SiLU gate, f32 on VPU/EUP
    acc_ref[...] += jnp.dot(h.astype(w2_ref.dtype), w2_ref[...],
                            preferred_element_type=jnp.float32)

    @pl.when(k == pl.num_programs(1) - 1)
    def _finalize():
        o_ref[...] = acc_ref[...].astype(o_ref.dtype)


def feedforward_pallas(x: jax.Array, params: FFNParams, *,
                       vmem_budget: int | None = None) -> jax.Array:
    """Fused SwiGLU FFN forward using pre-prepared weights."""
    dim, ht, n_ht = params.dim, params.ht, params.n_ht
    assert x.shape[-1] == dim, (x.shape, dim)

    orig_shape = x.shape
    rows = math.prod(orig_shape[:-1]) if len(orig_shape) > 1 else 1
    x2d = x.reshape(rows, dim)

    xsize = jnp.dtype(x.dtype).itemsize
    wsize = jnp.dtype(params.w13.dtype).itemsize
    if vmem_budget is None:
        vmem_budget = _default_vmem_budget()

    resident = (n_ht == 1)
    wbuf = 1 if resident else 2                              # single vs double buffered
    weight_vmem = wbuf * (dim * 2 * ht + ht * dim) * wsize   # w13 tile + w2 tile

    # Per-row VMEM: x (2 bufs) + out (2 bufs) + f32 acc scratch + in-kernel temps
    # (h13 + h in f32, cast copy of h, f32 result of the down projection).
    per_row = (2 * dim * xsize          # x, double-buffered
               + 2 * dim * xsize        # out, double-buffered
               + dim * 4                # f32 accumulator scratch
               + 3 * ht * 4             # h13 (2*ht) + h (ht) in f32
               + ht * wsize             # h cast to weight dtype
               + dim * 4)               # f32 down-projection result before cast

    sub = 16 if xsize == 2 else 8
    avail = vmem_budget - weight_vmem - (2 << 20)            # fixed margin
    if avail < per_row * sub:
        raise ValueError(
            f"FFN weight tiles ({weight_vmem} B) leave no room for row tiles in the "
            f"VMEM budget ({vmem_budget} B); re-run prepare_ffn_weights with a "
            f"smaller hidden_tile.")

    tile = max(sub, min(avail // per_row, 4096))
    mxu = 256 if tile >= 256 else (128 if tile >= 128 else sub)
    tile = (tile // mxu) * mxu
    # Guarantee >=2 row tiles when rows allow, so both v7x TensorCores get work.
    if rows > 2 * mxu and tile >= rows:
        tile = _round_up(_cdiv(rows, 2), mxu)
    if tile >= rows:
        tile = rows if (rows < sub or rows % sub == 0) else (rows // sub) * sub

    n_row_tiles = _cdiv(rows, tile)
    grid = (n_row_tiles, n_ht)

    out_shape = jax.ShapeDtypeStruct((rows, dim), x.dtype)

    x_map = lambda i, k: (i, 0)
    w13_map = lambda i, k: (0, k)
    w2_map = lambda i, k: (k, 0)
    o_map = lambda i, k: (i, 0)

    def build(single_buffer_weights: bool):
        if single_buffer_weights and resident:
            # Constant index map -> fetched once; single buffer halves weight VMEM.
            w13_spec = pl.BlockSpec((dim, 2 * ht), w13_map, pipeline_mode=pl.Buffered(1))
            w2_spec = pl.BlockSpec((ht, dim), w2_map, pipeline_mode=pl.Buffered(1))
        else:
            w13_spec = pl.BlockSpec((dim, 2 * ht), w13_map)
            w2_spec = pl.BlockSpec((ht, dim), w2_map)
        return pl.pallas_call(
            _swiglu_ffn_kernel,
            out_shape=out_shape,
            grid_spec=pltpu.PrefetchScalarGridSpec(
                num_scalar_prefetch=0,
                grid=grid,
                in_specs=[pl.BlockSpec((tile, dim), x_map), w13_spec, w2_spec],
                out_specs=pl.BlockSpec((tile, dim), o_map),
                scratch_shapes=[pltpu.VMEM((tile, dim), jnp.float32)],
            ),
            compiler_params=pltpu.CompilerParams(
                dimension_semantics=("parallel", "arbitrary"),
                vmem_limit_bytes=int(vmem_budget),
            ),
        )

    try:
        out2d = build(True)(x2d, params.w13, params.w2t)
    except Exception:
        # Fallback if pipeline_mode=Buffered(1) is unsupported in this JAX build.
        out2d = build(False)(x2d, params.w13, params.w2t)

    return out2d.reshape(orig_shape)


def feedforward(x, w1, w2, w3):
    """Drop-in convenience matching the module signature (prep NOT hoisted)."""
    return feedforward_pallas(x, prepare_ffn_weights(w1, w2, w3))


def feedforward_ref(x, w1, w2, w3):
    xf = x.astype(jnp.float32)
    h1 = xf @ w1.astype(jnp.float32).T
    h3 = xf @ w3.astype(jnp.float32).T
    h = (h1 * jax.nn.sigmoid(h1)) * h3
    return (h @ w2.astype(jnp.float32).T).astype(x.dtype)


if __name__ == "__main__":
    key = jax.random.PRNGKey(0)

    # ---- Test 1: module-consistent small shapes (resident-weight path) ----
    # dim=32, hidden_dim arg=128, multiple_of=32, ffn_dim_multiplier=None -> hidden=96.
    batch, seq, dim = 2, 8, 32
    hidden_arg, multiple_of = 128, 32
    hidden_dim = int(2 * hidden_arg / 3)
    hidden_dim = multiple_of * ((hidden_dim + multiple_of - 1) // multiple_of)

    k1, k2, k3, k4, k5 = jax.random.split(key, 5)
    x = jax.random.normal(k1, (batch, seq, dim), dtype=jnp.float32)
    # nn.Linear(bias=False) weights in PyTorch (out_features, in_features) layout.
    w1 = jax.random.normal(k2, (hidden_dim, dim), dtype=jnp.float32) / math.sqrt(dim)
    w3 = jax.random.normal(k3, (hidden_dim, dim), dtype=jnp.float32) / math.sqrt(dim)
    w2 = jax.random.normal(k4, (dim, hidden_dim), dtype=jnp.float32) / math.sqrt(hidden_dim)

    params = prepare_ffn_weights(w1, w2, w3)          # prep hoisted (once)
    out = jax.block_until_ready(feedforward_pallas(x, params))
    ref = feedforward_ref(x, w1, w2, w3)
    assert out.shape == x.shape and out.dtype == x.dtype
    assert jnp.allclose(out, ref, atol=1e-2, rtol=1e-2), "resident-path mismatch"

    # ---- Test 2: hidden-tiled (streamed-weight) accumulator path ----
    dim2, hidden2 = 128, 320                           # 320 -> 3 tiles of 128 (padded to 384)
    ka, kb, kc = jax.random.split(k5, 3)
    x2 = jax.random.normal(k5, (1, 16, dim2), dtype=jnp.float32)
    w1b = jax.random.normal(ka, (hidden2, dim2), dtype=jnp.float32) / math.sqrt(dim2)
    w3b = jax.random.normal(kb, (hidden2, dim2), dtype=jnp.float32) / math.sqrt(dim2)
    w2b = jax.random.normal(kc, (dim2, hidden2), dtype=jnp.float32) / math.sqrt(hidden2)
    params2 = prepare_ffn_weights(w1b, w2b, w3b, hidden_tile=128)
    out2 = jax.block_until_ready(feedforward_pallas(x2, params2))
    ref2 = feedforward_ref(x2, w1b, w2b, w3b)
    assert out2.shape == x2.shape and out2.dtype == x2.dtype
    assert jnp.allclose(out2, ref2, atol=1e-2, rtol=1e-2), "tiled-path mismatch"

    print("KERNEL_OK")
</pallas_src>

<mosaic_0001>
module attributes {stable_mosaic.version = 11 : i64} {
  func.func @_swiglu_ffn_kernel(%arg0: i32, %arg1: i32, %arg2: memref<16x32xf32, #tpu.memory_space<vmem>>, %arg3: memref<32x256xf32, #tpu.memory_space<vmem>>, %arg4: memref<128x32xf32, #tpu.memory_space<vmem>>, %arg5: memref<16x32xf32, #tpu.memory_space<vmem>>, %arg6: memref<16x32xf32, #tpu.memory_space<vmem>>) attributes {dimension_semantics = [#tpu.dimension_semantics<parallel>, #tpu.dimension_semantics<arbitrary>], iteration_bounds = array<i64: 1, 1>, scalar_prefetch = 0 : i64, scratch_operands = 1 : i64, tpu.core_type = #tpu.core_type<tc>, window_params = [{transform_indices = @transform_0, window_bounds = array<i64: 16, 32>}, {pipeline_mode = #tpu.pipeline_mode<synchronous>, transform_indices = @transform_1, window_bounds = array<i64: 32, 256>}, {pipeline_mode = #tpu.pipeline_mode<synchronous>, transform_indices = @transform_2, window_bounds = array<i64: 128, 32>}, {transform_indices = @transform_3, window_bounds = array<i64: 16, 32>}]} {
    %c0_i32 = arith.constant 0 : i32
    %0 = arith.cmpi eq, %arg1, %c0_i32 : i32
    %1 = arith.extui %0 : i1 to i32
    %c0_i32_0 = arith.constant 0 : i32
    %2 = arith.cmpi ne, %1, %c0_i32_0 : i32
    scf.if %2 {
      %cst_14 = arith.constant 0.000000e+00 : f32
      %23 = vector.broadcast %cst_14 : f32 to vector<16x32xf32>
      %c0_15 = arith.constant 0 : index
      %c0_16 = arith.constant 0 : index
      %24 = vector.load %arg6[%c0_15, %c0_16] : memref<16x32xf32, #tpu.memory_space<vmem>>, vector<16x32xf32>
      tpu.vector_store %arg6[%c0_15, %c0_16], %23 {strides = array<i32>} : memref<16x32xf32, #tpu.memory_space<vmem>>, vector<16x32xf32>,
    } else {
    }
    %c0 = arith.constant 0 : index
    %c0_1 = arith.constant 0 : index
    %3 = vector.load %arg2[%c0, %c0_1] : memref<16x32xf32, #tpu.memory_space<vmem>>, vector<16x32xf32>
    %c0_2 = arith.constant 0 : index
    %c0_3 = arith.constant 0 : index
    %4 = vector.load %arg3[%c0_2, %c0_3] : memref<32x256xf32, #tpu.memory_space<vmem>>, vector<32x256xf32>
    %cst = arith.constant dense<0.000000e+00> : vector<16x256xf32>
    %5 = tpu.matmul %3, %4, %cst {dimension_numbers = #tpu.dot_dimension_numbers<[1], [0], [0], [1], [0, 0, 1, 1], [], []>} : vector<16x32xf32>, vector<32x256xf32>, vector<16x256xf32> -> vector<16x256xf32>
    %6 = vector.extract_strided_slice %5 {offsets = [0, 0], sizes = [16, 128], strides = [1, 1]} : vector<16x256xf32> to vector<16x128xf32>
    %7 = vector.extract_strided_slice %5 {offsets = [0, 128], sizes = [16, 128], strides = [1, 1]} : vector<16x256xf32> to vector<16x128xf32>
    %8 = arith.negf %6 : vector<16x128xf32>
    %9 = math.exp %8 : vector<16x128xf32>
    %cst_4 = arith.constant 1.000000e+00 : f32
    %10 = vector.broadcast %cst_4 : f32 to vector<16x128xf32>
    %11 = arith.addf %10, %9 : vector<16x128xf32>
    %12 = arith.divf %10, %11 : vector<16x128xf32>
    %13 = arith.mulf %6, %12 : vector<16x128xf32>
    %14 = arith.mulf %13, %7 : vector<16x128xf32>
    %c0_5 = arith.constant 0 : index
    %c0_6 = arith.constant 0 : index
    %15 = vector.load %arg6[%c0_5, %c0_6] : memref<16x32xf32, #tpu.memory_space<vmem>>, vector<16x32xf32>
    %c0_7 = arith.constant 0 : index
    %c0_8 = arith.constant 0 : index
    %16 = vector.load %arg4[%c0_7, %c0_8] : memref<128x32xf32, #tpu.memory_space<vmem>>, vector<128x32xf32>
    %cst_9 = arith.constant dense<0.000000e+00> : vector<16x32xf32>
    %17 = tpu.matmul %14, %16, %cst_9 {dimension_numbers = #tpu.dot_dimension_numbers<[1], [0], [0], [1], [0, 0, 1, 1], [], []>} : vector<16x128xf32>, vector<128x32xf32>, vector<16x32xf32> -> vector<16x32xf32>
    %18 = arith.addf %15, %17 : vector<16x32xf32>
    %c0_10 = arith.constant 0 : index
    %c0_11 = arith.constant 0 : index
    %19 = vector.load %arg6[%c0_10, %c0_11] : memref<16x32xf32, #tpu.memory_space<vmem>>, vector<16x32xf32>
    tpu.vector_store %arg6[%c0_10, %c0_11], %18 {strides = array<i32>} : memref<16x32xf32, #tpu.memory_space<vmem>>, vector<16x32xf32>,
    %c0_i32_12 = arith.constant 0 : i32
    %20 = arith.cmpi eq, %arg1, %c0_i32_12 : i32
    %21 = arith.extui %20 : i1 to i32
    %c0_i32_13 = arith.constant 0 : i32
    %22 = arith.cmpi ne, %21, %c0_i32_13 : i32
    scf.if %22 {
      %c0_14 = arith.constant 0 : index
      %c0_15 = arith.constant 0 : index
      %23 = vector.load %arg6[%c0_14, %c0_15] : memref<16x32xf32, #tpu.memory_space<vmem>>, vector<16x32xf32>
      %c0_16 = arith.constant 0 : index
      %c0_17 = arith.constant 0 : index
      %24 = vector.load %arg5[%c0_16, %c0_17] : memref<16x32xf32, #tpu.memory_space<vmem>>, vector<16x32xf32>
      tpu.vector_store %arg5[%c0_16, %c0_17], %23 {strides = array<i32>} : memref<16x32xf32, #tpu.memory_space<vmem>>, vector<16x32xf32>,
    } else {
    }
    return
  }
  func.func @transform_0(%arg0: i32, %arg1: i32) -> (i32, i32) {
    %c0_i32 = arith.constant 0 : i32
    %c0_i32_0 = arith.constant 0 : i32
    return %arg0, %c0_i32 : i32, i32
  }
  func.func @transform_1(%arg0: i32, %arg1: i32) -> (i32, i32) {
    %c0_i32 = arith.constant 0 : i32
    %c0_i32_0 = arith.constant 0 : i32
    return %c0_i32, %arg1 : i32, i32
  }
  func.func @transform_2(%arg0: i32, %arg1: i32) -> (i32, i32) {
    %c0_i32 = arith.constant 0 : i32
    %c0_i32_0 = arith.constant 0 : i32
    return %arg1, %c0_i32 : i32, i32
  }
  func.func @transform_3(%arg0: i32, %arg1: i32) -> (i32, i32) {
    %c0_i32 = arith.constant 0 : i32
    %c0_i32_0 = arith.constant 0 : i32
    return %arg0, %c0_i32 : i32, i32
  }
}

module attributes {stable_mosaic.version = 11 : i64} {
  func.func @_swiglu_ffn_kernel(%arg0: i32, %arg1: i32, %arg2: memref<16x32xf32, #tpu.memory_space<vmem>>, %arg3: memref<32x256xf32, #tpu.memory_space<vmem>>, %arg4: memref<128x32xf32, #tpu.memory_space<vmem>>, %arg5: memref<16x32xf32, #tpu.memory_space<vmem>>, %arg6: memref<16x32xf32, #tpu.memory_space<vmem>>) attributes {dimension_semantics = [#tpu.dimension_semantics<parallel>, #tpu.dimension_semantics<arbitrary>], iteration_bounds = array<i64: 1, 1>, scalar_prefetch = 0 : i64, scratch_operands = 1 : i64, tpu.core_type = #tpu.core_type<tc>, window_params = [{transform_indices = @transform_0, window_bounds = array<i64: 16, 32>}, {transform_indices = @transform_1, window_bounds = array<i64: 32, 256>}, {transform_indices = @transform_2, window_bounds = array<i64: 128, 32>}, {transform_indices = @transform_3, window_bounds = array<i64: 16, 32>}]} {
    %c0_i32 = arith.constant 0 : i32
    %0 = arith.cmpi eq, %arg1, %c0_i32 : i32
    %1 = arith.extui %0 : i1 to i32
    %c0_i32_0 = arith.constant 0 : i32
    %2 = arith.cmpi ne, %1, %c0_i32_0 : i32
    scf.if %2 {
      %cst_14 = arith.constant 0.000000e+00 : f32
      %23 = vector.broadcast %cst_14 : f32 to vector<16x32xf32>
      %c0_15 = arith.constant 0 : index
      %c0_16 = arith.constant 0 : index
      %24 = vector.load %arg6[%c0_15, %c0_16] : memref<16x32xf32, #tpu.memory_space<vmem>>, vector<16x32xf32>
      tpu.vector_store %arg6[%c0_15, %c0_16], %23 {strides = array<i32>} : memref<16x32xf32, #tpu.memory_space<vmem>>, vector<16x32xf32>,
    } else {
    }
    %c0 = arith.constant 0 : index
    %c0_1 = arith.constant 0 : index
    %3 = vector.load %arg2[%c0, %c0_1] : memref<16x32xf32, #tpu.memory_space<vmem>>, vector<16x32xf32>
    %c0_2 = arith.constant 0 : index
    %c0_3 = arith.constant 0 : index
    %4 = vector.load %arg3[%c0_2, %c0_3] : memref<32x256xf32, #tpu.memory_space<vmem>>, vector<32x256xf32>
    %cst = arith.constant dense<0.000000e+00> : vector<16x256xf32>
    %5 = tpu.matmul %3, %4, %cst {dimension_numbers = #tpu.dot_dimension_numbers<[1], [0], [0], [1], [0, 0, 1, 1], [], []>} : vector<16x32xf32>, vector<32x256xf32>, vector<16x256xf32> -> vector<16x256xf32>
    %6 = vector.extract_strided_slice %5 {offsets = [0, 0], sizes = [16, 128], strides = [1, 1]} : vector<16x256xf32> to vector<16x128xf32>
    %7 = vector.extract_strided_slice %5 {offsets = [0, 128], sizes = [16, 128], strides = [1, 1]} : vector<16x256xf32> to vector<16x128xf32>
    %8 = arith.negf %6 : vector<16x128xf32>
    %9 = math.exp %8 : vector<16x128xf32>
    %cst_4 = arith.constant 1.000000e+00 : f32
    %10 = vector.broadcast %cst_4 : f32 to vector<16x128xf32>
    %11 = arith.addf %10, %9 : vector<16x128xf32>
    %12 = arith.divf %10, %11 : vector<16x128xf32>
    %13 = arith.mulf %6, %12 : vector<16x128xf32>
    %14 = arith.mulf %13, %7 : vector<16x128xf32>
    %c0_5 = arith.constant 0 : index
    %c0_6 = arith.constant 0 : index
    %15 = vector.load %arg6[%c0_5, %c0_6] : memref<16x32xf32, #tpu.memory_space<vmem>>, vector<16x32xf32>
    %c0_7 = arith.constant 0 : index
    %c0_8 = arith.constant 0 : index
    %16 = vector.load %arg4[%c0_7, %c0_8] : memref<128x32xf32, #tpu.memory_space<vmem>>, vector<128x32xf32>
    %cst_9 = arith.constant dense<0.000000e+00> : vector<16x32xf32>
    %17 = tpu.matmul %14, %16, %cst_9 {dimension_numbers = #tpu.dot_dimension_numbers<[1], [0], [0], [1], [0, 0, 1, 1], [], []>} : vector<16x128xf32>, vector<128x32xf32>, vector<16x32xf32> -> vector<16x32xf32>
    %18 = arith.addf %15, %17 : vector<16x32xf32>
    %c0_10 = arith.constant 0 : index
    %c0_11 = arith.constant 0 : index
    %19 = vector.load %arg6[%c0_10, %c0_11] : memref<16x32xf32, #tpu.memory_space<vmem>>, vector<16x32xf32>
    tpu.vector_store %arg6[%c0_10, %c0_11], %18 {strides = array<i32>} : memref<16x32xf32, #tpu.memory_space<vmem>>, vector<16x32xf32>,
    %c0_i32_12 = arith.constant 0 : i32
    %20 = arith.cmpi eq, %arg1, %c0_i32_12 : i32
    %21 = arith.extui %20 : i1 to i32
    %c0_i32_13 = arith.constant 0 : i32
    %22 = arith.cmpi ne, %21, %c0_i32_13 : i32
    scf.if %22 {
      %c0_14 = arith.constant 0 : index
      %c0_15 = arith.constant 0 : index
      %23 = vector.load %arg6[%c0_14, %c0_15] : memref<16x32xf32, #tpu.memory_space<vmem>>, vector<16x32xf32>
      %c0_16 = arith.constant 0 : index
      %c0_17 = arith.constant 0 : index
      %24 = vector.load %arg5[%c0_16, %c0_17] : memref<16x32xf32, #tpu.memory_space<vmem>>, vector<16x32xf32>
      tpu.vector_store %arg5[%c0_16, %c0_17], %23 {strides = array<i32>} : memref<16x32xf32, #tpu.memory_space<vmem>>, vector<16x32xf32>,
    } else {
    }
    return
  }
  func.func @transform_0(%arg0: i32, %arg1: i32) -> (i32, i32) {
    %c0_i32 = arith.constant 0 : i32
    %c0_i32_0 = arith.constant 0 : i32
    return %arg0, %c0_i32 : i32, i32
  }
  func.func @transform_1(%arg0: i32, %arg1: i32) -> (i32, i32) {
    %c0_i32 = arith.constant 0 : i32
    %c0_i32_0 = arith.constant 0 : i32
    return %c0_i32, %arg1 : i32, i32
  }
  func.func @transform_2(%arg0: i32, %arg1: i32) -> (i32, i32) {
    %c0_i32 = arith.constant 0 : i32
    %c0_i32_0 = arith.constant 0 : i32
    return %arg1, %c0_i32 : i32, i32
  }
  func.func @transform_3(%arg0: i32, %arg1: i32) -> (i32, i32) {
    %c0_i32 = arith.constant 0 : i32
    %c0_i32_0 = arith.constant 0 : i32
    return %arg0, %c0_i32 : i32, i32
  }
}

</mosaic_0001>

<bundles_post_ra>
// kernel: tpu_custom_call.1
= control target key start
LH: loop header
LB: loop body
LE: loop exit
PB: predicated region body
PF: predicated region fallthrough
CT: control target
= control target key end

     0   :  { %vm19_vm0 = vcmask 261120   ;;  %v343_v4 = vmov 0.0   ;;  %s456_s0 = inlined_call_operand.vmem [shape: f32[16,32], index: 0, kind: input, shape index: {}]   ;;  %s457_s1 = inlined_call_operand.vmem [shape: f32[32,256], index: 1, kind: input, shape index: {}]   ;;  %s458_s2 = inlined_call_operand.vmem [shape: f32[128,32], index: 2, kind: input, shape index: {}]   ;;  %s459_s3 = inlined_call_operand.hbm [shape: f32[16,32], index: 3, kind: output, shape index: {}]  }
   0x1   :  { %v31_v0 = vld [vmem:[%s457_s1 + $0x38] sm:$0xff]  ;;  %v30_v1 = vld [vmem:[%s457_s1 + $0x30] sm:$0xff]  ;;  %v29_v2 = vld [vmem:[%s457_s1 + $0x28] sm:$0xff]  ;;  %20 = vst.msk [vmem:[#allocation2] sm:$0xff] %vm19_vm0, %v343_v4  ;;  %103 = vmatprep.mubr.f32.mxu0 %v343_v4 }
   0x2   :  { %63 = vmatprep.subr.mxu0 %v31_v0  ;;  %v28_v3 = vld [vmem:[%s457_s1 + $0x20] sm:$0xff]  ;;  %21 = vst.msk [vmem:[#allocation2 + $0x8] sm:$0xff] %vm19_vm0, %v343_v4  ;;  %v27_v5 = vld [vmem:[%s457_s1 + $0x18] sm:$0xff]  ;;  %v26_v6 = vld [vmem:[%s457_s1 + $0x10] sm:$0xff] }
   0x3   :  { %64 = vmatpush1.msra.mxu0 %v30_v1 }
   0x4   :  { %65 = vmatprep.subr.mxu0 %v29_v2 }
   0x5   :  { %8 = vsyncpa [#allocation4], 0  ;;  %66 = vmatpush1.msra.mxu0 %v28_v3  ;;  %v25_v7 = vld [vmem:[%s457_s1 + $0x8] sm:$0xff]  ;;  %v24_v8 = vld [vmem:[%s457_s1] sm:$0xff] }
   0x6   :  { %67 = vmatprep.subr.mxu0 %v27_v5  ;;  %v22_v9 = vld [vmem:[%s456_s0] sm:$0xff]  ;;  %v23_v10 = vld [vmem:[%s456_s0 + $0x8] sm:$0xff]  ;;  %v149_v11 = vld [vmem:[%s458_s2 + $0x78] sm:$0xff] }
   0x7   :  { %68 = vmatpush1.msra.mxu0 %v26_v6  ;;  %274 = vmatprep.subr.mxu1 %v149_v11  ;;  %v148_v12 = vld [vmem:[%s458_s2 + $0x70] sm:$0xff]  ;;  %v147_v13 = vld [vmem:[%s458_s2 + $0x68] sm:$0xff]  ;;  %v146_v14 = vld [vmem:[%s458_s2 + $0x60] sm:$0xff] }
   0x8   :  { %69 = vmatprep.subr.mxu0 %v25_v7  ;;  %275 = vmatpush3.msra.mxu1 %v149_v11  ;;  %v145_v15 = vld [vmem:[%s458_s2 + $0x58] sm:$0xff]  ;;  %v144_v16 = vld [vmem:[%s458_s2 + $0x50] sm:$0xff]  ;;  %v143_v17 = vld [vmem:[%s458_s2 + $0x48] sm:$0xff] }
   0x9   :  { %70 = vmatpush1.msra.mxu0 %v24_v8  ;;  %276 = vmatprep.subr.mxu1 %v148_v12  ;;  %v142_v18 = vld [vmem:[%s458_s2 + $0x40] sm:$0xff]  ;;  %v141_v19 = vld [vmem:[%s458_s2 + $0x38] sm:$0xff]  ;;  %v140_v20 = vld [vmem:[%s458_s2 + $0x30] sm:$0xff] }
   0xa   :  { %252 = vmatmul.mubr.msk.f32.vlgmr.msra.gmra.mxu0 %vm19_vm0, %v22_v9  ;;  %277 = vmatpush3.msra.mxu1 %v148_v12  ;;  %v139_v21 = vld [vmem:[%s458_s2 + $0x28] sm:$0xff]  ;;  %v138_v22 = vld [vmem:[%s458_s2 + $0x20] sm:$0xff]  ;;  %v137_v23 = vld [vmem:[%s458_s2 + $0x18] sm:$0xff] }
   0xb   :  { %109 = vmatprep.mubr.f32.mxu0 %v343_v4  ;;  %278 = vmatprep.subr.mxu1 %v147_v13  ;;  %v136_v24 = vld [vmem:[%s458_s2 + $0x10] sm:$0xff]  ;;  %v135_v25 = vld [vmem:[%s458_s2 + $0x8] sm:$0xff]  ;;  %v134_v26 = vld [vmem:[%s458_s2] sm:$0xff]  ;;  %s344_s2 = smov [#allocation3]  }
   0xc   :  { %279 = vmatpush3.msra.mxu1 %v147_v13  ;;  %v133_v43 = vld [vmem:[#allocation2 + $0x8] sm:$0xff]  ;;  %v132_v45 = vld [vmem:[#allocation2] sm:$0xff]  ;;  %s241_s7 = sshll.u32 %s344_s2, 4  ;;  %s242_s7 = int_to_ptr.vmem [resolvable:$true] %s241_s7 }
   0xd   :  { %280 = vmatprep.subr.mxu1 %v146_v14  ;;  %s321_s8 = scalar_lea.vmem %s242_s7, 256  ;;  %p326_p1 = scmp.lt.s32.totalorder %s242_s7, %s242_s7 }
   0xe   :  { %253 = vmatmul.mubr.msk.f32.gmra.mxu0 %vm19_vm0, %v23_v10  ;;  %281 = vmatpush3.msra.mxu1 %v146_v14  ;;  %p322_p0 = scmp.ne.s32.totalorder %s242_s7, %s321_s8  ;;  %p327_p2 = scmp.lt.s32.totalorder %s321_s8, %s321_s8 }
   0xf   :  { %282 = vmatprep.subr.mxu1 %v145_v15 }
  0x10   :  { %283 = vmatpush3.msra.mxu1 %v145_v15  ;;  %p328_p3 = por %p327_p2, %p326_p1 }
  0x11   :  { %284 = vmatprep.subr.mxu1 %v144_v16 }
  0x12   :  { %285 = vmatpush3.msra.mxu1 %v144_v16  ;;  %p329_p4 = pnand %p328_p3, %p322_p0 }
  0x13   :  { %286 = vmatprep.subr.mxu1 %v143_v17 }
  0x14   :  { %287 = vmatpush3.msra.mxu1 %v143_v17 }
  0x15   :  { %288 = vmatprep.subr.mxu1 %v142_v18 }
  0x16   :  { %289 = vmatpush3.msra.mxu1 %v142_v18 }
  0x17   :  { %290 = vmatprep.subr.mxu1 %v141_v19 }
  0x18   :  { %291 = vmatpush3.msra.mxu1 %v141_v19 }
  0x19   :  { %292 = vmatprep.subr.mxu1 %v140_v20 }
  0x1a   :  { %293 = vmatpush3.msra.mxu1 %v140_v20 }
  0x1b   :  { %294 = vmatprep.subr.mxu1 %v139_v21 }
  0x1c   :  { %295 = vmatpush3.msra.mxu1 %v139_v21 }
  0x1d   :  { %296 = vmatprep.subr.mxu1 %v138_v22 }
  0x1e   :  { %297 = vmatpush3.msra.mxu1 %v138_v22 }
  0x1f   :  { %298 = vmatprep.subr.mxu1 %v137_v23 }
  0x20   :  { %299 = vmatpush3.msra.mxu1 %v137_v23 }
  0x21   :  { %300 = vmatprep.subr.mxu1 %v136_v24 }
  0x22   :  { %301 = vmatpush3.msra.mxu1 %v136_v24 }
  0x23   :  { %302 = vmatprep.subr.mxu1 %v135_v25 }
  0x24   :  { %303 = vmatpush3.msra.mxu1 %v135_v25 }
  0x25   :  { %304 = vmatprep.subr.mxu1 %v134_v26 }
  0x26   :  { %305 = vmatpush3.msra.mxu1 %v134_v26 }
  0xca   :  { %v105_v27 = vpop.f32.mrf.mxu0 }
  0xcb   :  { %v254_v28 = vmul.f32 -1.442695, %v105_v27 }
  0xcc   :  { %v107_v29 = vpop.f32.mrf.mxu0 }
  0xcd   :  { %313 = vpow2.f32 %v254_v28 }
  0xce   :  { %v111_v30 = vpop.f32.mrf.mxu0 }
  0xcf   :  { %v255_v31 = vmul.f32 -1.442695, %v111_v30 }
  0xd0   :  { %v113_v41 = vpop.f32.mrf.mxu0 }
  0xd1   :  { %315 = vpow2.f32 %v255_v31 }
  0xda   :  { %v314_v32 = vpop.eup %313 }
  0xdb   :  { %v122_v33 = vadd.f32 1.0, %v314_v32 }
  0xdd   :  { %317 = vrcp.f32 %v122_v33 }
  0xde   :  { %v316_v34 = vpop.eup %315 }
  0xdf   :  { %v123_v35 = vadd.f32 1.0, %v316_v34 }
  0xe1   :  { %319 = vrcp.f32 %v123_v35 }
  0xea   :  { %v318_v36 = vpop.eup %317 }
  0xeb   :  { %v128_v37 = vmul.f32 %v318_v36, %v105_v27 }
  0xed   :  { %v130_v38 = vmul.f32 %v128_v37, %v107_v29 }
  0xee   :  { %v320_v39 = vpop.eup %319 }
  0xef   :  { %v129_v40 = vmul.f32 %v320_v39, %v111_v30  ;;  %306 = vmatprep.mubr.f32.mxu1 %v130_v38 }
  0xf1   :  { %v131_v42 = vmul.f32 %v129_v40, %v113_v41 }
  0xf3   :  { %307 = vmatmul.mubr.f32.vlgmr.msra.gmra.mxu1 %v131_v42 }
 0x1b3   :  { %v308_v44 = vpop.f32.mrf.mxu1 }
 0x1b4   :  { %v226_v46 = vadd.f32 %v308_v44, %v133_v43 }
 0x1b5   :  { %v216_v47 = vpop.f32.mrf.mxu1 }
 0x1b6   :  { %228 = vst.msk [vmem:[#allocation2 + $0x8] sm:$0xff] %vm19_vm0, %v226_v46  ;;  %v225_v48 = vadd.f32 %v216_v47, %v132_v45 }
 0x1b8   :  { %227 = vst.msk [vmem:[#allocation2] sm:$0xff] %vm19_vm0, %v225_v48 }
 0x1bd   :  { %v233_v49 = vld [vmem:[#allocation2 + $0x8] sm:$0xff] }
 0x1be   :  { %235 = vst.msk [vmem:[#allocation3 + $0x8] sm:$0xff] %vm19_vm0, %v233_v49 }
 0x1bf   :  { %v232_v50 = vld [vmem:[#allocation2] sm:$0xff] }
 0x1c0   :  { %234 = vst.msk [vmem:[#allocation3] sm:$0xff] %vm19_vm0, %v232_v50 }
 0x1c1   :  { %332 = shalt.err (!%p329_p4)
}
 0x1c2   :  { %s345_s9 = smov 128   ;;  %s346_s0 = smov 8  }
 0x1c3   :  { %247 = dma.vmem_to_hbm [thread:$0]  %s242_s7, 256, %s459_s3, [#allocation4], %s345_s9, %s345_s9, %s346_s0  }
 0x1c4   :  { %341 = dma.done.wait [#allocation4], 256  }
 0x1c5   :  { %342 = vsyncadd [#allocation4], 4294967040 }
 0x1c6   :  { %251 = vsyncpa [#allocation4], 1 }

// kernel: tpu_custom_call.1
= control target key start
LH: loop header
LB: loop body
LE: loop exit
PB: predicated region body
PF: predicated region fallthrough
CT: control target
= control target key end

     0   :  { %vm19_vm0 = vcmask 261120   ;;  %v343_v4 = vmov 0.0   ;;  %s456_s0 = inlined_call_operand.vmem [shape: f32[16,32], index: 0, kind: input, shape index: {}]   ;;  %s457_s1 = inlined_call_operand.vmem [shape: f32[32,256], index: 1, kind: input, shape index: {}]   ;;  %s458_s2 = inlined_call_operand.vmem [shape: f32[128,32], index: 2, kind: input, shape index: {}]   ;;  %s459_s3 = inlined_call_operand.hbm [shape: f32[16,32], index: 3, kind: output, shape index: {}]  }
   0x1   :  { %v31_v0 = vld [vmem:[%s457_s1 + $0x38] sm:$0xff]  ;;  %v30_v1 = vld [vmem:[%s457_s1 + $0x30] sm:$0xff]  ;;  %v29_v2 = vld [vmem:[%s457_s1 + $0x28] sm:$0xff]  ;;  %20 = vst.msk [vmem:[#allocation2] sm:$0xff] %vm19_vm0, %v343_v4  ;;  %103 = vmatprep.mubr.f32.mxu0 %v343_v4 }
   0x2   :  { %63 = vmatprep.subr.mxu0 %v31_v0  ;;  %v28_v3 = vld [vmem:[%s457_s1 + $0x20] sm:$0xff]  ;;  %21 = vst.msk [vmem:[#allocation2 + $0x8] sm:$0xff] %vm19_vm0, %v343_v4  ;;  %v27_v5 = vld [vmem:[%s457_s1 + $0x18] sm:$0xff]  ;;  %v26_v6 = vld [vmem:[%s457_s1 + $0x10] sm:$0xff] }
   0x3   :  { %64 = vmatpush1.msra.mxu0 %v30_v1 }
   0x4   :  { %65 = vmatprep.subr.mxu0 %v29_v2 }
   0x5   :  { %8 = vsyncpa [#allocation4], 0  ;;  %66 = vmatpush1.msra.mxu0 %v28_v3  ;;  %v25_v7 = vld [vmem:[%s457_s1 + $0x8] sm:$0xff]  ;;  %v24_v8 = vld [vmem:[%s457_s1] sm:$0xff] }
   0x6   :  { %67 = vmatprep.subr.mxu0 %v27_v5  ;;  %v22_v9 = vld [vmem:[%s456_s0] sm:$0xff]  ;;  %v23_v10 = vld [vmem:[%s456_s0 + $0x8] sm:$0xff]  ;;  %v149_v11 = vld [vmem:[%s458_s2 + $0x78] sm:$0xff] }
   0x7   :  { %68 = vmatpush1.msra.mxu0 %v26_v6  ;;  %274 = vmatprep.subr.mxu1 %v149_v11  ;;  %v148_v12 = vld [vmem:[%s458_s2 + $0x70] sm:$0xff]  ;;  %v147_v13 = vld [vmem:[%s458_s2 + $0x68] sm:$0xff]  ;;  %v146_v14 = vld [vmem:[%s458_s2 + $0x60] sm:$0xff] }
   0x8   :  { %69 = vmatprep.subr.mxu0 %v25_v7  ;;  %275 = vmatpush3.msra.mxu1 %v149_v11  ;;  %v145_v15 = vld [vmem:[%s458_s2 + $0x58] sm:$0xff]  ;;  %v144_v16 = vld [vmem:[%s458_s2 + $0x50] sm:$0xff]  ;;  %v143_v17 = vld [vmem:[%s458_s2 + $0x48] sm:$0xff] }
   0x9   :  { %70 = vmatpush1.msra.mxu0 %v24_v8  ;;  %276 = vmatprep.subr.mxu1 %v148_v12  ;;  %v142_v18 = vld [vmem:[%s458_s2 + $0x40] sm:$0xff]  ;;  %v141_v19 = vld [vmem:[%s458_s2 + $0x38] sm:$0xff]  ;;  %v140_v20 = vld [vmem:[%s458_s2 + $0x30] sm:$0xff] }
   0xa   :  { %252 = vmatmul.mubr.msk.f32.vlgmr.msra.gmra.mxu0 %vm19_vm0, %v22_v9  ;;  %277 = vmatpush3.msra.mxu1 %v148_v12  ;;  %v139_v21 = vld [vmem:[%s458_s2 + $0x28] sm:$0xff]  ;;  %v138_v22 = vld [vmem:[%s458_s2 + $0x20] sm:$0xff]  ;;  %v137_v23 = vld [vmem:[%s458_s2 + $0x18] sm:$0xff] }
   0xb   :  { %109 = vmatprep.mubr.f32.mxu0 %v343_v4  ;;  %278 = vmatprep.subr.mxu1 %v147_v13  ;;  %v136_v24 = vld [vmem:[%s458_s2 + $0x10] sm:$0xff]  ;;  %v135_v25 = vld [vmem:[%s458_s2 + $0x8] sm:$0xff]  ;;  %v134_v26 = vld [vmem:[%s458_s2] sm:$0xff]  ;;  %s344_s2 = smov [#allocation3]  }
   0xc   :  { %279 = vmatpush3.msra.mxu1 %v147_v13  ;;  %v133_v43 = vld [vmem:[#allocation2 + $0x8] sm:$0xff]  ;;  %v132_v45 = vld [vmem:[#allocation2] sm:$0xff]  ;;  %s241_s7 = sshll.u32 %s344_s2, 4  ;;  %s242_s7 = int_to_ptr.vmem [resolvable:$true] %s241_s7 }
   0xd   :  { %280 = vmatprep.subr.mxu1 %v146_v14  ;;  %s321_s8 = scalar_lea.vmem %s242_s7, 256  ;;  %p326_p1 = scmp.lt.s32.totalorder %s242_s7, %s242_s7 }
   0xe   :  { %253 = vmatmul.mubr.msk.f32.gmra.mxu0 %vm19_vm0, %v23_v10  ;;  %281 = vmatpush3.msra.mxu1 %v146_v14  ;;  %p322_p0 = scmp.ne.s32.totalorder %s242_s7, %s321_s8  ;;  %p327_p2 = scmp.lt.s32.totalorder %s321_s8, %s321_s8 }
   0xf   :  { %282 = vmatprep.subr.mxu1 %v145_v15 }
  0x10   :  { %283 = vmatpush3.msra.mxu1 %v145_v15  ;;  %p328_p3 = por %p327_p2, %p326_p1 }
  0x11   :  { %284 = vmatprep.subr.mxu1 %v144_v16 }
  0x12   :  { %285 = vmatpush3.msra.mxu1 %v144_v16  ;;  %p329_p4 = pnand %p328_p3, %p322_p0 }
  0x13   :  { %286 = vmatprep.subr.mxu1 %v143_v17 }
  0x14   :  { %287 = vmatpush3.msra.mxu1 %v143_v17 }
  0x15   :  { %288 = vmatprep.subr.mxu1 %v142_v18 }
  0x16   :  { %289 = vmatpush3.msra.mxu1 %v142_v18 }
  0x17   :  { %290 = vmatprep.subr.mxu1 %v141_v19 }
  0x18   :  { %291 = vmatpush3.msra.mxu1 %v141_v19 }
  0x19   :  { %292 = vmatprep.subr.mxu1 %v140_v20 }
  0x1a   :  { %293 = vmatpush3.msra.mxu1 %v140_v20 }
  0x1b   :  { %294 = vmatprep.subr.mxu1 %v139_v21 }
  0x1c   :  { %295 = vmatpush3.msra.mxu1 %v139_v21 }
  0x1d   :  { %296 = vmatprep.subr.mxu1 %v138_v22 }
  0x1e   :  { %297 = vmatpush3.msra.mxu1 %v138_v22 }
  0x1f   :  { %298 = vmatprep.subr.mxu1 %v137_v23 }
  0x20   :  { %299 = vmatpush3.msra.mxu1 %v137_v23 }
  0x21   :  { %300 = vmatprep.subr.mxu1 %v136_v24 }
  0x22   :  { %301 = vmatpush3.msra.mxu1 %v136_v24 }
  0x23   :  { %302 = vmatprep.subr.mxu1 %v135_v25 }
  0x24   :  { %303 = vmatpush3.msra.mxu1 %v135_v25 }
  0x25   :  { %304 = vmatprep.subr.mxu1 %v134_v26 }
  0x26   :  { %305 = vmatpush3.msra.mxu1 %v134_v26 }
  0xca   :  { %v105_v27 = vpop.f32.mrf.mxu0 }
  0xcb   :  { %v254_v28 = vmul.f32 -1.442695, %v105_v27 }
  0xcc   :  { %v107_v29 = vpop.f32.mrf.mxu0 }
  0xcd   :  { %313 = vpow2.f32 %v254_v28 }
  0xce   :  { %v111_v30 = vpop.f32.mrf.mxu0 }
  0xcf   :  { %v255_v31 = vmul.f32 -1.442695, %v111_v30 }
  0xd0   :  { %v113_v41 = vpop.f32.mrf.mxu0 }
  0xd1   :  { %315 = vpow2.f32 %v255_v31 }
  0xda   :  { %v314_v32 = vpop.eup %313 }
  0xdb   :  { %v122_v33 = vadd.f32 1.0, %v314_v32 }
  0xdd   :  { %317 = vrcp.f32 %v122_v33 }
  0xde   :  { %v316_v34 = vpop.eup %315 }
  0xdf   :  { %v123_v35 = vadd.f32 1.0, %v316_v34 }
  0xe1   :  { %319 = vrcp.f32 %v123_v35 }
  0xea   :  { %v318_v36 = vpop.eup %317 }
  0xeb   :  { %v128_v37 = vmul.f32 %v318_v36, %v105_v27 }
  0xed   :  { %v130_v38 = vmul.f32 %v128_v37, %v107_v29 }
  0xee   :  { %v320_v39 = vpop.eup %319 }
  0xef   :  { %v129_v40 = vmul.f32 %v320_v39, %v111_v30  ;;  %306 = vmatprep.mubr.f32.mxu1 %v130_v38 }
  0xf1   :  { %v131_v42 = vmul.f32 %v129_v40, %v113_v41 }
  0xf3   :  { %307 = vmatmul.mubr.f32.vlgmr.msra.gmra.mxu1 %v131_v42 }
 0x1b3   :  { %v308_v44 = vpop.f32.mrf.mxu1 }
 0x1b4   :  { %v226_v46 = vadd.f32 %v308_v44, %v133_v43 }
 0x1b5   :  { %v216_v47 = vpop.f32.mrf.mxu1 }
 0x1b6   :  { %228 = vst.msk [vmem:[#allocation2 + $0x8] sm:$0xff] %vm19_vm0, %v226_v46  ;;  %v225_v48 = vadd.f32 %v216_v47, %v132_v45 }
 0x1b8   :  { %227 = vst.msk [vmem:[#allocation2] sm:$0xff] %vm19_vm0, %v225_v48 }
 0x1bd   :  { %v233_v49 = vld [vmem:[#allocation2 + $0x8] sm:$0xff] }
 0x1be   :  { %235 = vst.msk [vmem:[#allocation3 + $0x8] sm:$0xff] %vm19_vm0, %v233_v49 }
 0x1bf   :  { %v232_v50 = vld [vmem:[#allocation2] sm:$0xff] }
 0x1c0   :  { %234 = vst.msk [vmem:[#allocation3] sm:$0xff] %vm19_vm0, %v232_v50 }
 0x1c1   :  { %332 = shalt.err (!%p329_p4)
}
 0x1c2   :  { %s345_s9 = smov 128   ;;  %s346_s0 = smov 8  }
 0x1c3   :  { %247 = dma.vmem_to_hbm [thread:$0]  %s242_s7, 256, %s459_s3, [#allocation4], %s345_s9, %s345_s9, %s346_s0  }
 0x1c4   :  { %341 = dma.done.wait [#allocation4], 256  }
 0x1c5   :  { %342 = vsyncadd [#allocation4], 4294967040 }
 0x1c6   :  { %251 = vsyncpa [#allocation4], 1 }

</bundles_post_ra>
